<compile_context>
chip_gen: v5e
topology: v5e:2x2
jax: 0.10.0
libtpu: 0.0.40
codegen_flags: <defaults>
</compile_context>

<pallas_src>
import functools
import math

import jax
import jax.numpy as jnp
import numpy as np
from jax import lax
from jax.experimental import pallas as pl
from jax.experimental.pallas import tpu as pltpu


def _logaddexp(a, b):
    m = jnp.maximum(a, b)
    return m + jnp.log(jnp.exp(a - m) + jnp.exp(b - m))


def _treecrf_kernel(x_ref, w_ref, b_ref, epu_ref, epd_ref,
                    scat_ref, gath_ref, mask_ref, out_ref, *, n_levels):
    # --- emissions on the MXU: em[l, b] = (W x^T + bias)[l, b] --------------
    # x block is (B_tile, F); contract the F axes directly (no host transpose).
    em = lax.dot_general(
        w_ref[...], x_ref[...],
        dimension_numbers=(((1,), (1,)), ((), ())),
        preferred_element_type=jnp.float32) + b_ref[...]

    e1 = em            # class-1 emission scores, (L, B)
    e0 = -em           # class-0 emission scores

    # Per-child pairwise potentials, (L, 1) columns broadcast over batch lanes.
    pu00 = epu_ref[:, 0:1]; pu01 = epu_ref[:, 1:2]      # pairs[parent, child]
    pu10 = epu_ref[:, 2:3]; pu11 = epu_ref[:, 3:4]
    pd00 = epd_ref[:, 0:1]; pd01 = epd_ref[:, 1:2]      # pairs[child, parent]
    pd10 = epd_ref[:, 2:3]; pd11 = epd_ref[:, 3:4]

    zero = jnp.zeros_like(em)

    # --- upward pass (leaves -> roots), one vectorised update per level -----
    a0 = zero
    a1 = zero
    for d in reversed(range(n_levels)):
        l0 = e0 + a0
        l1 = e1 + a1
        m0 = _logaddexp(l0 + pu00, l1 + pu01)
        m1 = _logaddexp(l0 + pu10, l1 + pu11)
        s = scat_ref[d]                       # (L, L) child->parent scatter
        a0 = a0 + jnp.dot(s, m0, preferred_element_type=jnp.float32)
        a1 = a1 + jnp.dot(s, m1, preferred_element_type=jnp.float32)

    # --- downward pass (roots -> leaves) -------------------------------------
    b0 = zero
    b1 = zero
    for d in range(n_levels):
        l0 = e0 + b0
        l1 = e1 + b1
        g = gath_ref[d]                       # (L, L) parent->child gather
        g0 = jnp.dot(g, l0, preferred_element_type=jnp.float32)
        g1 = jnp.dot(g, l1, preferred_element_type=jnp.float32)
        m0 = _logaddexp(g0 + pd00, g1 + pd01)
        m1 = _logaddexp(g0 + pd10, g1 + pd11)
        msk = mask_ref[d]                     # (L, 1): 1.0 for nodes at this level
        b0 = b0 + msk * m0
        b1 = b1 + msk * m1

    # --- marginals: P(y_l = 1 | x) = sigmoid(s1 - s0) ------------------------
    s0 = e0 + a0 + b0
    s1 = e1 + a1 + b1
    out_ref[...] = pl.reciprocal(1.0 + jnp.exp(s0 - s1), approx=True)


def tree_crf_forward(x, weight, bias, pairs, parent_of, *, b_tile=128):
    """x: (B, F), weight: (L, F), bias: (L,), pairs: (L, L, 2, 2) -> (B, L)."""
    B, F = x.shape
    L = weight.shape[0]
    parent_of = tuple(int(p) for p in parent_of)

    # --- static tree structure -> per-level scatter / gather matrices --------
    depth = [0] * L
    for j in range(L):
        p = parent_of[j]
        depth[j] = 0 if p < 0 else depth[p] + 1
    n_levels = max(max(depth) if L else 0, 1)
    scat_np = np.zeros((n_levels, L, L), np.float32)
    for j in range(L):
        p = parent_of[j]
        if p >= 0:
            scat_np[depth[j] - 1, p, j] = 1.0          # scatter child j -> parent p
    gath_np = np.ascontiguousarray(np.transpose(scat_np, (0, 2, 1)))
    mask_np = scat_np.sum(axis=1)[:, :, None]          # (n_levels, L, 1)

    # --- per-child pairwise-potential columns (static gather, runtime values) -
    pa_idx = np.array([p if p >= 0 else 0 for p in parent_of], np.int32)
    ch_idx = np.arange(L, dtype=np.int32)
    ep_up = pairs[pa_idx, ch_idx].reshape(L, 4).astype(jnp.float32)  # pairs[parent, child]
    ep_dn = pairs[ch_idx, pa_idx].reshape(L, 4).astype(jnp.float32)  # pairs[child, parent]
    # (root rows hold dummy values; they are zeroed by the scatter/gather/mask)

    # --- pad batch to a lane-dense multiple of the tile -----------------------
    b_pad = ((B + b_tile - 1) // b_tile) * b_tile
    x_p = jnp.zeros((b_pad, F), jnp.float32).at[:B].set(x.astype(jnp.float32))

    kernel = functools.partial(_treecrf_kernel, n_levels=n_levels)
    out_lb = pl.pallas_call(
        kernel,
        out_shape=jax.ShapeDtypeStruct((L, b_pad), jnp.float32),
        grid=(b_pad // b_tile,),
        in_specs=[
            pl.BlockSpec((b_tile, F), lambda i: (i, 0)),           # x tile (pipelined)
            pl.BlockSpec((L, F), lambda i: (0, 0)),                # W (resident)
            pl.BlockSpec((L, 1), lambda i: (0, 0)),                # bias
            pl.BlockSpec((L, 4), lambda i: (0, 0)),                # pairs[parent, child]
            pl.BlockSpec((L, 4), lambda i: (0, 0)),                # pairs[child, parent]
            pl.BlockSpec((n_levels, L, L), lambda i: (0, 0, 0)),   # scatter mats
            pl.BlockSpec((n_levels, L, L), lambda i: (0, 0, 0)),   # gather mats
            pl.BlockSpec((n_levels, L, 1), lambda i: (0, 0, 0)),   # level masks
        ],
        out_specs=pl.BlockSpec((L, b_tile), lambda i: (0, i)),     # lane-dense output
        compiler_params=pltpu.CompilerParams(
            dimension_semantics=("parallel",),
            vmem_limit_bytes=32 * 1024 * 1024),
    )(x_p,
      weight.astype(jnp.float32),
      bias.reshape(L, 1).astype(jnp.float32),
      ep_up, ep_dn,
      jnp.asarray(scat_np), jnp.asarray(gath_np), jnp.asarray(mask_np))
    return out_lb[:, :B].T                                          # (B, L)


def reference_forward(x, weight, bias, pairs, parent_of):
    """Pure-numpy replica of the PyTorch TreeCRF.forward semantics."""
    x = np.asarray(x, np.float64)
    weight = np.asarray(weight, np.float64)
    bias = np.asarray(bias, np.float64)
    pairs = np.asarray(pairs, np.float64)
    B, _ = x.shape
    L = weight.shape[0]

    def lse(a, axis):
        m = a.max(axis=axis, keepdims=True)
        return np.squeeze(m + np.log(np.exp(a - m).sum(axis=axis, keepdims=True)),
                          axis=axis)

    em = x @ weight.T + bias                       # (B, L)
    e = np.stack([-em, em], axis=2)                # (B, L, 2)

    alphas = np.zeros((B, L, 2))
    for j in reversed(range(L)):
        local = e[:, j, :] + alphas[:, j, :]
        i = parent_of[j]
        if i >= 0:
            msg = lse(local[:, None, :] + pairs[i, j][None, :, :], 2)
            alphas[:, i, :] += msg

    betas = np.zeros((B, L, 2))
    for j in range(L):
        local = e[:, j, :] + betas[:, j, :]
        for i in [c for c in range(L) if parent_of[c] == j]:
            msg = lse(local[:, None, :] + pairs[i, j][None, :, :], 2)
            betas[:, i, :] += msg

    scores = e + alphas + betas
    logZ = lse(scores, 2)[..., None]
    return np.exp((scores - logZ)[:, :, 1])        # (B, L)


if __name__ == "__main__":
    B, F, L = 8, 32, 8
    # Tree hierarchy (TreeMatrix surrogate): parent index per node, -1 = root.
    # Indices are in topological order (parent index < child index).
    parent_of = (-1, 0, 0, 1, 1, 2, 2, 3)

    key = jax.random.PRNGKey(0)
    kx, kw, kb, kp = jax.random.split(key, 4)
    bound = 1.0 / math.sqrt(F)
    x = jax.random.normal(kx, (B, F), jnp.float32)
    weight = jax.random.uniform(kw, (L, F), jnp.float32, -bound, bound)
    bias = jax.random.uniform(kb, (L,), jnp.float32, -bound, bound)
    pairs = jax.random.uniform(kp, (L, L, 2, 2), jnp.float32, 0.1, 1.0)

    out = tree_crf_forward(x, weight, bias, pairs, parent_of)
    out = jax.block_until_ready(out)

    ref = reference_forward(np.array(x), np.array(weight), np.array(bias),
                            np.array(pairs), parent_of)
    out_np = np.array(out)
    assert out_np.shape == (B, L)
    assert np.all(np.isfinite(out_np))
    assert np.all(out_np >= -1e-6) and np.all(out_np <= 1.0 + 1e-3)
    np.testing.assert_allclose(out_np, ref, atol=2e-3, rtol=2e-3)
    print("KERNEL_OK")
</pallas_src>

<mosaic_0001>
module attributes {stable_mosaic.version = 11 : i64} {
  func.func @_treecrf_kernel(%arg0: i32, %arg1: memref<128x32xf32, #tpu.memory_space<vmem>>, %arg2: memref<8x32xf32, #tpu.memory_space<vmem>>, %arg3: memref<8x1xf32, #tpu.memory_space<vmem>>, %arg4: memref<8x4xf32, #tpu.memory_space<vmem>>, %arg5: memref<8x4xf32, #tpu.memory_space<vmem>>, %arg6: memref<3x8x8xf32, #tpu.memory_space<vmem>>, %arg7: memref<3x8x8xf32, #tpu.memory_space<vmem>>, %arg8: memref<3x8x1xf32, #tpu.memory_space<vmem>>, %arg9: memref<8x128xf32, #tpu.memory_space<vmem>>) attributes {dimension_semantics = [#tpu.dimension_semantics<parallel>], iteration_bounds = array<i64: 1>, scalar_prefetch = 0 : i64, scratch_operands = 0 : i64, tpu.core_type = #tpu.core_type<tc>, window_params = [{transform_indices = @transform_0, window_bounds = array<i64: 128, 32>}, {pipeline_mode = #tpu.pipeline_mode<synchronous>, transform_indices = @transform_1, window_bounds = array<i64: 8, 32>}, {pipeline_mode = #tpu.pipeline_mode<synchronous>, transform_indices = @transform_2, window_bounds = array<i64: 8, 1>}, {pipeline_mode = #tpu.pipeline_mode<synchronous>, transform_indices = @transform_3, window_bounds = array<i64: 8, 4>}, {pipeline_mode = #tpu.pipeline_mode<synchronous>, transform_indices = @transform_4, window_bounds = array<i64: 8, 4>}, {pipeline_mode = #tpu.pipeline_mode<synchronous>, transform_indices = @transform_5, window_bounds = array<i64: 3, 8, 8>}, {pipeline_mode = #tpu.pipeline_mode<synchronous>, transform_indices = @transform_6, window_bounds = array<i64: 3, 8, 8>}, {pipeline_mode = #tpu.pipeline_mode<synchronous>, transform_indices = @transform_7, window_bounds = array<i64: 3, 8, 1>}, {transform_indices = @transform_8, window_bounds = array<i64: 8, 128>}]} {
    %c0 = arith.constant 0 : index
    %c0_0 = arith.constant 0 : index
    %0 = vector.load %arg2[%c0, %c0_0] : memref<8x32xf32, #tpu.memory_space<vmem>>, vector<8x32xf32>
    %c0_1 = arith.constant 0 : index
    %c0_2 = arith.constant 0 : index
    %1 = vector.load %arg1[%c0_1, %c0_2] : memref<128x32xf32, #tpu.memory_space<vmem>>, vector<128x32xf32>
    %cst = arith.constant dense<0.000000e+00> : vector<8x128xf32>
    %2 = tpu.matmul %0, %1, %cst {dimension_numbers = #tpu.dot_dimension_numbers<[1], [1], [0], [0], [0, 0, 1, 0], [], []>} : vector<8x32xf32>, vector<128x32xf32>, vector<8x128xf32> -> vector<8x128xf32>
    %c0_3 = arith.constant 0 : index
    %c0_4 = arith.constant 0 : index
    %3 = vector.load %arg3[%c0_3, %c0_4] : memref<8x1xf32, #tpu.memory_space<vmem>>, vector<8x1xf32>
    %4 = vector.broadcast %3 : vector<8x1xf32> to vector<8x128xf32>
    %5 = arith.addf %2, %4 : vector<8x128xf32>
    %cst_5 = arith.constant 0.000000e+00 : f32
    %6 = vector.broadcast %cst_5 : f32 to vector<8x128xf32>
    %7 = arith.subf %6, %5 : vector<8x128xf32>
    %c0_6 = arith.constant 0 : index
    %c0_7 = arith.constant 0 : index
    %8 = vector.load %arg4[%c0_6, %c0_7] : memref<8x4xf32, #tpu.memory_space<vmem>>, vector<8x1xf32>
    %c0_8 = arith.constant 0 : index
    %c1 = arith.constant 1 : index
    %9 = vector.load %arg4[%c0_8, %c1] : memref<8x4xf32, #tpu.memory_space<vmem>>, vector<8x1xf32>
    %c0_9 = arith.constant 0 : index
    %c2 = arith.constant 2 : index
    %10 = vector.load %arg4[%c0_9, %c2] : memref<8x4xf32, #tpu.memory_space<vmem>>, vector<8x1xf32>
    %c0_10 = arith.constant 0 : index
    %c3 = arith.constant 3 : index
    %11 = vector.load %arg4[%c0_10, %c3] : memref<8x4xf32, #tpu.memory_space<vmem>>, vector<8x1xf32>
    %c0_11 = arith.constant 0 : index
    %c0_12 = arith.constant 0 : index
    %12 = vector.load %arg5[%c0_11, %c0_12] : memref<8x4xf32, #tpu.memory_space<vmem>>, vector<8x1xf32>
    %c0_13 = arith.constant 0 : index
    %c1_14 = arith.constant 1 : index
    %13 = vector.load %arg5[%c0_13, %c1_14] : memref<8x4xf32, #tpu.memory_space<vmem>>, vector<8x1xf32>
    %c0_15 = arith.constant 0 : index
    %c2_16 = arith.constant 2 : index
    %14 = vector.load %arg5[%c0_15, %c2_16] : memref<8x4xf32, #tpu.memory_space<vmem>>, vector<8x1xf32>
    %c0_17 = arith.constant 0 : index
    %c3_18 = arith.constant 3 : index
    %15 = vector.load %arg5[%c0_17, %c3_18] : memref<8x4xf32, #tpu.memory_space<vmem>>, vector<8x1xf32>
    %cst_19 = arith.constant 0.000000e+00 : f32
    %16 = vector.broadcast %cst_19 : f32 to vector<8x128xf32>
    %17 = arith.addf %7, %16 : vector<8x128xf32>
    %18 = arith.addf %5, %16 : vector<8x128xf32>
    %19 = vector.broadcast %8 : vector<8x1xf32> to vector<8x128xf32>
    %20 = arith.addf %17, %19 : vector<8x128xf32>
    %21 = vector.broadcast %9 : vector<8x1xf32> to vector<8x128xf32>
    %22 = arith.addf %18, %21 : vector<8x128xf32>
    %23 = arith.maximumf %20, %22 : vector<8x128xf32>
    %24 = arith.subf %20, %23 : vector<8x128xf32>
    %25 = math.exp %24 : vector<8x128xf32>
    %26 = arith.subf %22, %23 : vector<8x128xf32>
    %27 = math.exp %26 : vector<8x128xf32>
    %28 = arith.addf %25, %27 : vector<8x128xf32>
    %29 = math.log %28 : vector<8x128xf32>
    %30 = arith.addf %23, %29 : vector<8x128xf32>
    %31 = vector.broadcast %10 : vector<8x1xf32> to vector<8x128xf32>
    %32 = arith.addf %17, %31 : vector<8x128xf32>
    %33 = vector.broadcast %11 : vector<8x1xf32> to vector<8x128xf32>
    %34 = arith.addf %18, %33 : vector<8x128xf32>
    %35 = arith.maximumf %32, %34 : vector<8x128xf32>
    %36 = arith.subf %32, %35 : vector<8x128xf32>
    %37 = math.exp %36 : vector<8x128xf32>
    %38 = arith.subf %34, %35 : vector<8x128xf32>
    %39 = math.exp %38 : vector<8x128xf32>
    %40 = arith.addf %37, %39 : vector<8x128xf32>
    %41 = math.log %40 : vector<8x128xf32>
    %42 = arith.addf %35, %41 : vector<8x128xf32>
    %c2_20 = arith.constant 2 : index
    %c0_21 = arith.constant 0 : index
    %c0_22 = arith.constant 0 : index
    %43 = vector.load %arg6[%c2_20, %c0_21, %c0_22] : memref<3x8x8xf32, #tpu.memory_space<vmem>>, vector<1x8x8xf32>
    %44 = vector.shape_cast %43 : vector<1x8x8xf32> to vector<8x8xf32>
    %cst_23 = arith.constant dense<0.000000e+00> : vector<8x128xf32>
    %45 = tpu.matmul %44, %30, %cst_23 {dimension_numbers = #tpu.dot_dimension_numbers<[1], [0], [0], [1], [0, 0, 1, 1], [], []>} : vector<8x8xf32>, vector<8x128xf32>, vector<8x128xf32> -> vector<8x128xf32>
    %46 = arith.addf %16, %45 : vector<8x128xf32>
    %cst_24 = arith.constant dense<0.000000e+00> : vector<8x128xf32>
    %47 = tpu.matmul %44, %42, %cst_24 {dimension_numbers = #tpu.dot_dimension_numbers<[1], [0], [0], [1], [0, 0, 1, 1], [], []>} : vector<8x8xf32>, vector<8x128xf32>, vector<8x128xf32> -> vector<8x128xf32>
    %48 = arith.addf %16, %47 : vector<8x128xf32>
    %49 = arith.addf %7, %46 : vector<8x128xf32>
    %50 = arith.addf %5, %48 : vector<8x128xf32>
    %51 = vector.broadcast %8 : vector<8x1xf32> to vector<8x128xf32>
    %52 = arith.addf %49, %51 : vector<8x128xf32>
    %53 = vector.broadcast %9 : vector<8x1xf32> to vector<8x128xf32>
    %54 = arith.addf %50, %53 : vector<8x128xf32>
    %55 = arith.maximumf %52, %54 : vector<8x128xf32>
    %56 = arith.subf %52, %55 : vector<8x128xf32>
    %57 = math.exp %56 : vector<8x128xf32>
    %58 = arith.subf %54, %55 : vector<8x128xf32>
    %59 = math.exp %58 : vector<8x128xf32>
    %60 = arith.addf %57, %59 : vector<8x128xf32>
    %61 = math.log %60 : vector<8x128xf32>
    %62 = arith.addf %55, %61 : vector<8x128xf32>
    %63 = vector.broadcast %10 : vector<8x1xf32> to vector<8x128xf32>
    %64 = arith.addf %49, %63 : vector<8x128xf32>
    %65 = vector.broadcast %11 : vector<8x1xf32> to vector<8x128xf32>
    %66 = arith.addf %50, %65 : vector<8x128xf32>
    %67 = arith.maximumf %64, %66 : vector<8x128xf32>
    %68 = arith.subf %64, %67 : vector<8x128xf32>
    %69 = math.exp %68 : vector<8x128xf32>
    %70 = arith.subf %66, %67 : vector<8x128xf32>
    %71 = math.exp %70 : vector<8x128xf32>
    %72 = arith.addf %69, %71 : vector<8x128xf32>
    %73 = math.log %72 : vector<8x128xf32>
    %74 = arith.addf %67, %73 : vector<8x128xf32>
    %c1_25 = arith.constant 1 : index
    %c0_26 = arith.constant 0 : index
    %c0_27 = arith.constant 0 : index
    %75 = vector.load %arg6[%c1_25, %c0_26, %c0_27] : memref<3x8x8xf32, #tpu.memory_space<vmem>>, vector<1x8x8xf32>
    %76 = vector.shape_cast %75 : vector<1x8x8xf32> to vector<8x8xf32>
    %cst_28 = arith.constant dense<0.000000e+00> : vector<8x128xf32>
    %77 = tpu.matmul %76, %62, %cst_28 {dimension_numbers = #tpu.dot_dimension_numbers<[1], [0], [0], [1], [0, 0, 1, 1], [], []>} : vector<8x8xf32>, vector<8x128xf32>, vector<8x128xf32> -> vector<8x128xf32>
    %78 = arith.addf %46, %77 : vector<8x128xf32>
    %cst_29 = arith.constant dense<0.000000e+00> : vector<8x128xf32>
    %79 = tpu.matmul %76, %74, %cst_29 {dimension_numbers = #tpu.dot_dimension_numbers<[1], [0], [0], [1], [0, 0, 1, 1], [], []>} : vector<8x8xf32>, vector<8x128xf32>, vector<8x128xf32> -> vector<8x128xf32>
    %80 = arith.addf %48, %79 : vector<8x128xf32>
    %81 = arith.addf %7, %78 : vector<8x128xf32>
    %82 = arith.addf %5, %80 : vector<8x128xf32>
    %83 = vector.broadcast %8 : vector<8x1xf32> to vector<8x128xf32>
    %84 = arith.addf %81, %83 : vector<8x128xf32>
    %85 = vector.broadcast %9 : vector<8x1xf32> to vector<8x128xf32>
    %86 = arith.addf %82, %85 : vector<8x128xf32>
    %87 = arith.maximumf %84, %86 : vector<8x128xf32>
    %88 = arith.subf %84, %87 : vector<8x128xf32>
    %89 = math.exp %88 : vector<8x128xf32>
    %90 = arith.subf %86, %87 : vector<8x128xf32>
    %91 = math.exp %90 : vector<8x128xf32>
    %92 = arith.addf %89, %91 : vector<8x128xf32>
    %93 = math.log %92 : vector<8x128xf32>
    %94 = arith.addf %87, %93 : vector<8x128xf32>
    %95 = vector.broadcast %10 : vector<8x1xf32> to vector<8x128xf32>
    %96 = arith.addf %81, %95 : vector<8x128xf32>
    %97 = vector.broadcast %11 : vector<8x1xf32> to vector<8x128xf32>
    %98 = arith.addf %82, %97 : vector<8x128xf32>
    %99 = arith.maximumf %96, %98 : vector<8x128xf32>
    %100 = arith.subf %96, %99 : vector<8x128xf32>
    %101 = math.exp %100 : vector<8x128xf32>
    %102 = arith.subf %98, %99 : vector<8x128xf32>
    %103 = math.exp %102 : vector<8x128xf32>
    %104 = arith.addf %101, %103 : vector<8x128xf32>
    %105 = math.log %104 : vector<8x128xf32>
    %106 = arith.addf %99, %105 : vector<8x128xf32>
    %c0_30 = arith.constant 0 : index
    %c0_31 = arith.constant 0 : index
    %c0_32 = arith.constant 0 : index
    %107 = vector.load %arg6[%c0_30, %c0_31, %c0_32] : memref<3x8x8xf32, #tpu.memory_space<vmem>>, vector<1x8x8xf32>
    %108 = vector.shape_cast %107 : vector<1x8x8xf32> to vector<8x8xf32>
    %cst_33 = arith.constant dense<0.000000e+00> : vector<8x128xf32>
    %109 = tpu.matmul %108, %94, %cst_33 {dimension_numbers = #tpu.dot_dimension_numbers<[1], [0], [0], [1], [0, 0, 1, 1], [], []>} : vector<8x8xf32>, vector<8x128xf32>, vector<8x128xf32> -> vector<8x128xf32>
    %110 = arith.addf %78, %109 : vector<8x128xf32>
    %cst_34 = arith.constant dense<0.000000e+00> : vector<8x128xf32>
    %111 = tpu.matmul %108, %106, %cst_34 {dimension_numbers = #tpu.dot_dimension_numbers<[1], [0], [0], [1], [0, 0, 1, 1], [], []>} : vector<8x8xf32>, vector<8x128xf32>, vector<8x128xf32> -> vector<8x128xf32>
    %112 = arith.addf %80, %111 : vector<8x128xf32>
    %113 = arith.addf %7, %16 : vector<8x128xf32>
    %114 = arith.addf %5, %16 : vector<8x128xf32>
    %c0_35 = arith.constant 0 : index
    %c0_36 = arith.constant 0 : index
    %c0_37 = arith.constant 0 : index
    %115 = vector.load %arg7[%c0_35, %c0_36, %c0_37] : memref<3x8x8xf32, #tpu.memory_space<vmem>>, vector<1x8x8xf32>
    %116 = vector.shape_cast %115 : vector<1x8x8xf32> to vector<8x8xf32>
    %cst_38 = arith.constant dense<0.000000e+00> : vector<8x128xf32>
    %117 = tpu.matmul %116, %113, %cst_38 {dimension_numbers = #tpu.dot_dimension_numbers<[1], [0], [0], [1], [0, 0, 1, 1], [], []>} : vector<8x8xf32>, vector<8x128xf32>, vector<8x128xf32> -> vector<8x128xf32>
    %cst_39 = arith.constant dense<0.000000e+00> : vector<8x128xf32>
    %118 = tpu.matmul %116, %114, %cst_39 {dimension_numbers = #tpu.dot_dimension_numbers<[1], [0], [0], [1], [0, 0, 1, 1], [], []>} : vector<8x8xf32>, vector<8x128xf32>, vector<8x128xf32> -> vector<8x128xf32>
    %119 = vector.broadcast %12 : vector<8x1xf32> to vector<8x128xf32>
    %120 = arith.addf %117, %119 : vector<8x128xf32>
    %121 = vector.broadcast %13 : vector<8x1xf32> to vector<8x128xf32>
    %122 = arith.addf %118, %121 : vector<8x128xf32>
    %123 = arith.maximumf %120, %122 : vector<8x128xf32>
    %124 = arith.subf %120, %123 : vector<8x128xf32>
    %125 = math.exp %124 : vector<8x128xf32>
    %126 = arith.subf %122, %123 : vector<8x128xf32>
    %127 = math.exp %126 : vector<8x128xf32>
    %128 = arith.addf %125, %127 : vector<8x128xf32>
    %129 = math.log %128 : vector<8x128xf32>
    %130 = arith.addf %123, %129 : vector<8x128xf32>
    %131 = vector.broadcast %14 : vector<8x1xf32> to vector<8x128xf32>
    %132 = arith.addf %117, %131 : vector<8x128xf32>
    %133 = vector.broadcast %15 : vector<8x1xf32> to vector<8x128xf32>
    %134 = arith.addf %118, %133 : vector<8x128xf32>
    %135 = arith.maximumf %132, %134 : vector<8x128xf32>
    %136 = arith.subf %132, %135 : vector<8x128xf32>
    %137 = math.exp %136 : vector<8x128xf32>
    %138 = arith.subf %134, %135 : vector<8x128xf32>
    %139 = math.exp %138 : vector<8x128xf32>
    %140 = arith.addf %137, %139 : vector<8x128xf32>
    %141 = math.log %140 : vector<8x128xf32>
    %142 = arith.addf %135, %141 : vector<8x128xf32>
    %c0_40 = arith.constant 0 : index
    %c0_41 = arith.constant 0 : index
    %c0_42 = arith.constant 0 : index
    %143 = vector.load %arg8[%c0_40, %c0_41, %c0_42] : memref<3x8x1xf32, #tpu.memory_space<vmem>>, vector<1x8x1xf32>
    %144 = vector.shape_cast %143 : vector<1x8x1xf32> to vector<8x1xf32>
    %145 = vector.broadcast %144 : vector<8x1xf32> to vector<8x128xf32>
    %146 = arith.mulf %145, %130 : vector<8x128xf32>
    %147 = arith.addf %16, %146 : vector<8x128xf32>
    %148 = vector.broadcast %144 : vector<8x1xf32> to vector<8x128xf32>
    %149 = arith.mulf %148, %142 : vector<8x128xf32>
    %150 = arith.addf %16, %149 : vector<8x128xf32>
    %151 = arith.addf %7, %147 : vector<8x128xf32>
    %152 = arith.addf %5, %150 : vector<8x128xf32>
    %c1_43 = arith.constant 1 : index
    %c0_44 = arith.constant 0 : index
    %c0_45 = arith.constant 0 : index
    %153 = vector.load %arg7[%c1_43, %c0_44, %c0_45] : memref<3x8x8xf32, #tpu.memory_space<vmem>>, vector<1x8x8xf32>
    %154 = vector.shape_cast %153 : vector<1x8x8xf32> to vector<8x8xf32>
    %cst_46 = arith.constant dense<0.000000e+00> : vector<8x128xf32>
    %155 = tpu.matmul %154, %151, %cst_46 {dimension_numbers = #tpu.dot_dimension_numbers<[1], [0], [0], [1], [0, 0, 1, 1], [], []>} : vector<8x8xf32>, vector<8x128xf32>, vector<8x128xf32> -> vector<8x128xf32>
    %cst_47 = arith.constant dense<0.000000e+00> : vector<8x128xf32>
    %156 = tpu.matmul %154, %152, %cst_47 {dimension_numbers = #tpu.dot_dimension_numbers<[1], [0], [0], [1], [0, 0, 1, 1], [], []>} : vector<8x8xf32>, vector<8x128xf32>, vector<8x128xf32> -> vector<8x128xf32>
    %157 = vector.broadcast %12 : vector<8x1xf32> to vector<8x128xf32>
    %158 = arith.addf %155, %157 : vector<8x128xf32>
    %159 = vector.broadcast %13 : vector<8x1xf32> to vector<8x128xf32>
    %160 = arith.addf %156, %159 : vector<8x128xf32>
    %161 = arith.maximumf %158, %160 : vector<8x128xf32>
    %162 = arith.subf %158, %161 : vector<8x128xf32>
    %163 = math.exp %162 : vector<8x128xf32>
    %164 = arith.subf %160, %161 : vector<8x128xf32>
    %165 = math.exp %164 : vector<8x128xf32>
    %166 = arith.addf %163, %165 : vector<8x128xf32>
    %167 = math.log %166 : vector<8x128xf32>
    %168 = arith.addf %161, %167 : vector<8x128xf32>
    %169 = vector.broadcast %14 : vector<8x1xf32> to vector<8x128xf32>
    %170 = arith.addf %155, %169 : vector<8x128xf32>
    %171 = vector.broadcast %15 : vector<8x1xf32> to vector<8x128xf32>
    %172 = arith.addf %156, %171 : vector<8x128xf32>
    %173 = arith.maximumf %170, %172 : vector<8x128xf32>
    %174 = arith.subf %170, %173 : vector<8x128xf32>
    %175 = math.exp %174 : vector<8x128xf32>
    %176 = arith.subf %172, %173 : vector<8x128xf32>
    %177 = math.exp %176 : vector<8x128xf32>
    %178 = arith.addf %175, %177 : vector<8x128xf32>
    %179 = math.log %178 : vector<8x128xf32>
    %180 = arith.addf %173, %179 : vector<8x128xf32>
    %c1_48 = arith.constant 1 : index
    %c0_49 = arith.constant 0 : index
    %c0_50 = arith.constant 0 : index
    %181 = vector.load %arg8[%c1_48, %c0_49, %c0_50] : memref<3x8x1xf32, #tpu.memory_space<vmem>>, vector<1x8x1xf32>
    %182 = vector.shape_cast %181 : vector<1x8x1xf32> to vector<8x1xf32>
    %183 = vector.broadcast %182 : vector<8x1xf32> to vector<8x128xf32>
    %184 = arith.mulf %183, %168 : vector<8x128xf32>
    %185 = arith.addf %147, %184 : vector<8x128xf32>
    %186 = vector.broadcast %182 : vector<8x1xf32> to vector<8x128xf32>
    %187 = arith.mulf %186, %180 : vector<8x128xf32>
    %188 = arith.addf %150, %187 : vector<8x128xf32>
    %189 = arith.addf %7, %185 : vector<8x128xf32>
    %190 = arith.addf %5, %188 : vector<8x128xf32>
    %c2_51 = arith.constant 2 : index
    %c0_52 = arith.constant 0 : index
    %c0_53 = arith.constant 0 : index
    %191 = vector.load %arg7[%c2_51, %c0_52, %c0_53] : memref<3x8x8xf32, #tpu.memory_space<vmem>>, vector<1x8x8xf32>
    %192 = vector.shape_cast %191 : vector<1x8x8xf32> to vector<8x8xf32>
    %cst_54 = arith.constant dense<0.000000e+00> : vector<8x128xf32>
    %193 = tpu.matmul %192, %189, %cst_54 {dimension_numbers = #tpu.dot_dimension_numbers<[1], [0], [0], [1], [0, 0, 1, 1], [], []>} : vector<8x8xf32>, vector<8x128xf32>, vector<8x128xf32> -> vector<8x128xf32>
    %cst_55 = arith.constant dense<0.000000e+00> : vector<8x128xf32>
    %194 = tpu.matmul %192, %190, %cst_55 {dimension_numbers = #tpu.dot_dimension_numbers<[1], [0], [0], [1], [0, 0, 1, 1], [], []>} : vector<8x8xf32>, vector<8x128xf32>, vector<8x128xf32> -> vector<8x128xf32>
    %195 = vector.broadcast %12 : vector<8x1xf32> to vector<8x128xf32>
    %196 = arith.addf %193, %195 : vector<8x128xf32>
    %197 = vector.broadcast %13 : vector<8x1xf32> to vector<8x128xf32>
    %198 = arith.addf %194, %197 : vector<8x128xf32>
    %199 = arith.maximumf %196, %198 : vector<8x128xf32>
    %200 = arith.subf %196, %199 : vector<8x128xf32>
    %201 = math.exp %200 : vector<8x128xf32>
    %202 = arith.subf %198, %199 : vector<8x128xf32>
    %203 = math.exp %202 : vector<8x128xf32>
    %204 = arith.addf %201, %203 : vector<8x128xf32>
    %205 = math.log %204 : vector<8x128xf32>
    %206 = arith.addf %199, %205 : vector<8x128xf32>
    %207 = vector.broadcast %14 : vector<8x1xf32> to vector<8x128xf32>
    %208 = arith.addf %193, %207 : vector<8x128xf32>
    %209 = vector.broadcast %15 : vector<8x1xf32> to vector<8x128xf32>
    %210 = arith.addf %194, %209 : vector<8x128xf32>
    %211 = arith.maximumf %208, %210 : vector<8x128xf32>
    %212 = arith.subf %208, %211 : vector<8x128xf32>
    %213 = math.exp %212 : vector<8x128xf32>
    %214 = arith.subf %210, %211 : vector<8x128xf32>
    %215 = math.exp %214 : vector<8x128xf32>
    %216 = arith.addf %213, %215 : vector<8x128xf32>
    %217 = math.log %216 : vector<8x128xf32>
    %218 = arith.addf %211, %217 : vector<8x128xf32>
    %c2_56 = arith.constant 2 : index
    %c0_57 = arith.constant 0 : index
    %c0_58 = arith.constant 0 : index
    %219 = vector.load %arg8[%c2_56, %c0_57, %c0_58] : memref<3x8x1xf32, #tpu.memory_space<vmem>>, vector<1x8x1xf32>
    %220 = vector.shape_cast %219 : vector<1x8x1xf32> to vector<8x1xf32>
    %221 = vector.broadcast %220 : vector<8x1xf32> to vector<8x128xf32>
    %222 = arith.mulf %221, %206 : vector<8x128xf32>
    %223 = arith.addf %185, %222 : vector<8x128xf32>
    %224 = vector.broadcast %220 : vector<8x1xf32> to vector<8x128xf32>
    %225 = arith.mulf %224, %218 : vector<8x128xf32>
    %226 = arith.addf %188, %225 : vector<8x128xf32>
    %227 = arith.addf %7, %110 : vector<8x128xf32>
    %228 = arith.addf %227, %223 : vector<8x128xf32>
    %229 = arith.addf %5, %112 : vector<8x128xf32>
    %230 = arith.addf %229, %226 : vector<8x128xf32>
    %231 = arith.subf %228, %230 : vector<8x128xf32>
    %232 = math.exp %231 : vector<8x128xf32>
    %cst_59 = arith.constant 1.000000e+00 : f32
    %233 = vector.broadcast %cst_59 : f32 to vector<8x128xf32>
    %234 = arith.addf %233, %232 : vector<8x128xf32>
    %235 = tpu.reciprocal %234 {approx = true} : vector<8x128xf32> -> vector<8x128xf32>
    %c0_60 = arith.constant 0 : index
    %c0_61 = arith.constant 0 : index
    %236 = vector.load %arg9[%c0_60, %c0_61] : memref<8x128xf32, #tpu.memory_space<vmem>>, vector<8x128xf32>
    tpu.vector_store %arg9[%c0_60, %c0_61], %235 {strides = array<i32>} : memref<8x128xf32, #tpu.memory_space<vmem>>, vector<8x128xf32>,
    return
  }
  func.func @transform_0(%arg0: i32) -> (i32, i32) {
    %c0_i32 = arith.constant 0 : i32
    %c0_i32_0 = arith.constant 0 : i32
    return %arg0, %c0_i32 : i32, i32
  }
  func.func @transform_1(%arg0: i32) -> (i32, i32) {
    %c0_i32 = arith.constant 0 : i32
    %c0_i32_0 = arith.constant 0 : i32
    %c0_i32_1 = arith.constant 0 : i32
    return %c0_i32, %c0_i32_0 : i32, i32
  }
  func.func @transform_2(%arg0: i32) -> (i32, i32) {
    %c0_i32 = arith.constant 0 : i32
    %c0_i32_0 = arith.constant 0 : i32
    %c0_i32_1 = arith.constant 0 : i32
    return %c0_i32, %c0_i32_0 : i32, i32
  }
  func.func @transform_3(%arg0: i32) -> (i32, i32) {
    %c0_i32 = arith.constant 0 : i32
    %c0_i32_0 = arith.constant 0 : i32
    %c0_i32_1 = arith.constant 0 : i32
    return %c0_i32, %c0_i32_0 : i32, i32
  }
  func.func @transform_4(%arg0: i32) -> (i32, i32) {
    %c0_i32 = arith.constant 0 : i32
    %c0_i32_0 = arith.constant 0 : i32
    %c0_i32_1 = arith.constant 0 : i32
    return %c0_i32, %c0_i32_0 : i32, i32
  }
  func.func @transform_5(%arg0: i32) -> (i32, i32, i32) {
    %c0_i32 = arith.constant 0 : i32
    %c0_i32_0 = arith.constant 0 : i32
    %c0_i32_1 = arith.constant 0 : i32
    %c0_i32_2 = arith.constant 0 : i32
    return %c0_i32, %c0_i32_0, %c0_i32_1 : i32, i32, i32
  }
  func.func @transform_6(%arg0: i32) -> (i32, i32, i32) {
    %c0_i32 = arith.constant 0 : i32
    %c0_i32_0 = arith.constant 0 : i32
    %c0_i32_1 = arith.constant 0 : i32
    %c0_i32_2 = arith.constant 0 : i32
    return %c0_i32, %c0_i32_0, %c0_i32_1 : i32, i32, i32
  }
  func.func @transform_7(%arg0: i32) -> (i32, i32, i32) {
    %c0_i32 = arith.constant 0 : i32
    %c0_i32_0 = arith.constant 0 : i32
    %c0_i32_1 = arith.constant 0 : i32
    %c0_i32_2 = arith.constant 0 : i32
    return %c0_i32, %c0_i32_0, %c0_i32_1 : i32, i32, i32
  }
  func.func @transform_8(%arg0: i32) -> (i32, i32) {
    %c0_i32 = arith.constant 0 : i32
    %c0_i32_0 = arith.constant 0 : i32
    return %c0_i32, %arg0 : i32, i32
  }
}

</mosaic_0001>

<bundles_post_ra>
// kernel: tpu_custom_call.1
= control target key start
LH: loop header
LB: loop body
LE: loop exit
PB: predicated region body
PF: predicated region fallthrough
CT: control target
= control target key end

     0   :  { %vm53_vm0 = vcmask 261120   ;;  %s1065_s0 = inlined_call_operand.vmem [shape: f32[128,32], index: 0, kind: input, shape index: {}]   ;;  %s1066_s1 = inlined_call_operand.vmem [shape: f32[8,32], index: 1, kind: input, shape index: {}]   ;;  %s1067_s2 = inlined_call_operand.vmem [shape: f32[8,1], index: 2, kind: input, shape index: {}]   ;;  %s1068_s3 = inlined_call_operand.vmem [shape: f32[8,4], index: 3, kind: input, shape index: {}]   ;;  %s1069_s4 = inlined_call_operand.vmem [shape: f32[8,4], index: 4, kind: input, shape index: {}]   ;;  %s1070_s5 = inlined_call_operand.vmem [shape: f32[3,8,8], index: 5, kind: input, shape index: {}]   ;;  %s1071_s6 = inlined_call_operand.vmem [shape: f32[3,8,8], index: 6, kind: input, shape index: {}]   ;;  %s1072_s7 = inlined_call_operand.vmem [shape: f32[3,8,1], index: 7, kind: input, shape index: {}]   ;;  %s1073_s8 = inlined_call_operand.hbm [shape: f32[8,128], index: 8, kind: output, shape index: {}]  }
   0x1   :  { %v46_v0 = vld [vmem:[%s1065_s0 + $0x78] sm:$0xff]  ;;  %v45_v1 = vld [vmem:[%s1065_s0 + $0x70] sm:$0xff] }
   0x2   :  { %659 = vmatpush.xpose.msk.msra.mxu0 %vm53_vm0, %v46_v0 }
   0x3   :  { %13 = vsyncpa [#allocation3], 0  ;;  %v44_v2 = vld [vmem:[%s1065_s0 + $0x68] sm:$0xff]  ;;  %v43_v3 = vld [vmem:[%s1065_s0 + $0x60] sm:$0xff]  ;;  %v813_v11 = vmov 3   ;;  %v814_v13 = vmov 0  }
   0x4   :  { %v42_v4 = vld [vmem:[%s1065_s0 + $0x58] sm:$0xff]  ;;  %v41_v5 = vld [vmem:[%s1065_s0 + $0x50] sm:$0xff]  ;;  %v40_v6 = vld [vmem:[%s1065_s0 + $0x48] sm:$0xff]  ;;  %701 = vset.pattern.permute.xlu1 %v813_v11  ;;  %699 = vset.pattern.permute.xlu0 %v814_v13  ;;  %v815_v14 = vmov 1   ;;  %v816_v17 = vmov 2   ;;  %vm175_vm1 = vcmask 64512  }
   0x5   :  { %v39_v7 = vld [vmem:[%s1065_s0 + $0x40] sm:$0xff]  ;;  %v38_v8 = vld [vmem:[%s1065_s0 + $0x38] sm:$0xff]  ;;  %v37_v12 = vld [vmem:[%s1065_s0 + $0x30] sm:$0xff]  ;;  %703 = vset.pattern.permute.xlu2 %v815_v14  ;;  %s650_s13 = sshll.u32 %s1073_s8, 4  ;;  %s651_s13 = int_to_ptr.hbm [resolvable:$true] %s650_s13 }
   0x6   :  { %660 = vmatpush.xpose.msk.msra.mxu0 %vm53_vm0, %v45_v1  ;;  %v126_v9 = vld [vmem:[%s1068_s3] sm:$0xff]  ;;  %v36_v15 = vld [vmem:[%s1065_s0 + $0x28] sm:$0xff]  ;;  %v34_v18 = vld [vmem:[%s1065_s0 + $0x18] sm:$0xff] }
   0x7   :  { %v47_v10 = vld [vmem:[%s1067_s2] sm:$0xff]  ;;  %158 = vperm.xlu1 %701, %v126_v9   ;;  %137 = vperm.xlu2 %703, %v126_v9   ;;  %v33_v19 = vld [vmem:[%s1065_s0 + $0x10] sm:$0xff]  ;;  %v32_v20 = vld [vmem:[%s1065_s0 + $0x8] sm:$0xff] }
   0x8   :  { %50 = vperm.xlu0 %699, %v47_v10   ;;  %v35_v16 = vld [vmem:[%s1065_s0 + $0x20] sm:$0xff]  ;;  %v676_v56 = vld [vmem:[%s1070_s5 + $0x10] sm:$0xff] }
   0x9   :  { %v31_v21 = vld [vmem:[%s1065_s0] sm:$0xff] }
   0xa   :  { %661 = vmatpush.xpose.msk.msra.mxu0 %vm53_vm0, %v44_v2  ;;  %v30_v22 = vld [vmem:[%s1066_s1] sm:$0xff] }
   0xe   :  { %662 = vmatpush.xpose.msk.msra.mxu0 %vm53_vm0, %v43_v3 }
   0xf   :  { %702 = vset.pattern.permute.xlu1 %v814_v13  ;;  %704 = vset.pattern.permute.xlu2 %v814_v13 }
  0x10   :  { %700 = vset.pattern.permute.xlu0 %v816_v17  ;;  %132 = vperm.xlu1 %702, %v126_v9  }
  0x11   :  { %153 = vperm.xlu0 %700, %v126_v9  }
  0x12   :  { %663 = vmatpush.xpose.msk.msra.mxu0 %vm53_vm0, %v42_v4 }
  0x16   :  { %664 = vmatpush.xpose.msk.msra.mxu0 %vm53_vm0, %v41_v5 }
  0x18   :  { %705 = vset.pattern.permute.xlu1 %v815_v14 }
  0x19   :  { %707 = vset.pattern.permute.xlu0 %v813_v11 }
  0x1a   :  { %665 = vmatpush.xpose.msk.msra.mxu0 %vm53_vm0, %v40_v6 }
  0x1e   :  { %666 = vmatpush.xpose.msk.msra.mxu0 %vm53_vm0, %v39_v7 }
  0x22   :  { %667 = vmatpush.xpose.msk.msra.mxu0 %vm53_vm0, %v38_v8 }
  0x26   :  { %668 = vmatpush.xpose.msk.msra.mxu0 %vm53_vm0, %v37_v12 }
  0x2a   :  { %669 = vmatpush.xpose.msk.msra.mxu0 %vm53_vm0, %v36_v15 }
  0x2e   :  { %670 = vmatpush.xpose.msk.msra.mxu0 %vm53_vm0, %v35_v16 }
  0x32   :  { %671 = vmatpush.xpose.msk.msra.mxu0 %vm53_vm0, %v34_v18 }
  0x36   :  { %672 = vmatpush.xpose.msk.msra.mxu0 %vm53_vm0, %v33_v19 }
  0x3a   :  { %673 = vmatpush.xpose.msk.msra.mxu0 %vm53_vm0, %v32_v20 }
  0x3e   :  { %674 = vmatpush.xpose.msk.msra.mxu0 %vm53_vm0, %v31_v21 }
  0x41   :  { %675 = vmatmul.msk.f32.vlgmr.msra.gmra.mxu0 %vm53_vm0, %v30_v22 }
  0x61   :  { %v945_v27 = vpop.permute.xlu2 %137 }
  0x79   :  { %v941_v24 = vpop.permute.xlu1 %158 }
  0x7a   :  { %v51_v23 = vpop.permute.xlu0 %50 }
  0x82   :  { %v947_v28 = vpop.permute.xlu1 %132 }
  0x83   :  { %v949_v29 = vpop.permute.xlu0 %153 }
  0xbe   :  { %v122_v25 = vpop.f32.mrf.mxu0 }
  0xbf   :  { %v943_v26 = vadd.f32 %v122_v25, %v51_v23 }
  0xc1   :  { %v952_v30 = vsub.f32 0.0, %v943_v26  ;;  %v140_v31 = vadd.f32 %v945_v27, %v943_v26  ;;  %v161_v34 = vadd.f32 %v941_v24, %v943_v26 }
  0xc3   :  { %v135_v32 = vadd.f32 %v947_v28, %v952_v30  ;;  %v156_v33 = vadd.f32 %v949_v29, %v952_v30 }
  0xc5   :  { %v141_v35 = vmax.f32 %v135_v32, %v140_v31  ;;  %v162_v36 = vmax.f32 %v156_v33, %v161_v34 }
  0xc7   :  { %v142_v37 = vsub.f32 %v135_v32, %v141_v35  ;;  %v145_v38 = vsub.f32 %v140_v31, %v141_v35  ;;  %v163_v39 = vsub.f32 %v156_v33, %v162_v36  ;;  %v166_v40 = vsub.f32 %v161_v34, %v162_v36  ;;  %v679_v31 = vld [vmem:[%s1070_s5 + $0x8] sm:$0xff] }
  0xc9   :  { %v143_v41 = vmul.f32 1.442695, %v142_v37  ;;  %v146_v42 = vmul.f32 1.442695, %v145_v38  ;;  %v164_v43 = vmul.f32 1.442695, %v163_v39 }
  0xca   :  { %v167_v44 = vmul.f32 1.442695, %v166_v40 }
  0xcb   :  { %711 = vpow2.f32 %v143_v41 }
  0xcc   :  { %713 = vpow2.f32 %v146_v42 }
  0xcd   :  { %715 = vpow2.f32 %v164_v43  ;;  %v368_v43 = vld [vmem:[%s1071_s6] sm:$0xff] }
  0xce   :  { %717 = vpow2.f32 %v167_v44 }
  0xd1   :  { %v712_v45 = vpop.eup %711 }
  0xd2   :  { %v714_v46 = vpop.eup %713 }
  0xd3   :  { %v716_v47 = vpop.eup %715  ;;  %v148_v48 = vadd.f32 %v714_v46, %v712_v45 }
  0xd4   :  { %v718_v49 = vpop.eup %717 }
  0xd5   :  { %719 = vlog2.f32 %v148_v48  ;;  %v169_v50 = vadd.f32 %v718_v49, %v716_v47 }
  0xd7   :  { %721 = vlog2.f32 %v169_v50 }
  0xdb   :  { %v720_v51 = vpop.eup %719 }
  0xdc   :  { %v150_v52 = vmul.f32 0.6931472, %v720_v51 }
  0xdd   :  { %v722_v53 = vpop.eup %721 }
  0xde   :  { %v151_v54 = vadd.f32 %v150_v52, %v141_v35  ;;  %v171_v55 = vmul.f32 0.6931472, %v722_v53  ;;  %v455_v52 = vld [vmem:[%s1072_s7] sm:$0xff] }
  0xe0   :  { %194 = vmatpush.msra.mxu1 %v151_v54  ;;  %v172_v57 = vadd.f32 %v171_v55, %v162_v36 }
  0xe1   :  { %677 = vmatmul.msk.f32.vlgmr.msra.gmra.mxu1 %vm175_vm1, %v676_v56 }
  0xe2   :  { %214 = vmatpush.msra.mxu2 %v172_v57 }
  0xe3   :  { %678 = vmatmul.msk.f32.vlgmr.msra.gmra.mxu2 %vm175_vm1, %v676_v56 }
 0x15e   :  { %v196_v58 = vpop.f32.mrf.mxu1 }
 0x15f   :  { %v219_v59 = vadd.f32 %v196_v58, %v952_v30 }
 0x161   :  { %v221_v62 = vadd.f32 %v219_v59, %v947_v28  ;;  %v234_v63 = vadd.f32 %v219_v59, %v949_v29 }
 0x166   :  { %v216_v60 = vpop.f32.mrf.mxu2 }
 0x167   :  { %v220_v61 = vadd.f32 %v216_v60, %v943_v26 }
 0x169   :  { %v222_v0 = vadd.f32 %v220_v61, %v945_v27  ;;  %v235_v1 = vadd.f32 %v220_v61, %v941_v24 }
 0x16b   :  { %v236_v2 = vmax.f32 %v234_v63, %v235_v1  ;;  %v223_v3 = vmax.f32 %v221_v62, %v222_v0 }
 0x16d   :  { %v237_v4 = vsub.f32 %v234_v63, %v236_v2  ;;  %v240_v5 = vsub.f32 %v235_v1, %v236_v2  ;;  %v224_v6 = vsub.f32 %v221_v62, %v223_v3  ;;  %v227_v7 = vsub.f32 %v222_v0, %v223_v3 }
 0x16f   :  { %v238_v8 = vmul.f32 1.442695, %v237_v4  ;;  %v241_v9 = vmul.f32 1.442695, %v240_v5  ;;  %v225_v10 = vmul.f32 1.442695, %v224_v6 }
 0x170   :  { %v228_v11 = vmul.f32 1.442695, %v227_v7 }
 0x171   :  { %723 = vpow2.f32 %v238_v8 }
 0x172   :  { %725 = vpow2.f32 %v241_v9 }
 0x173   :  { %727 = vpow2.f32 %v225_v10 }
 0x174   :  { %729 = vpow2.f32 %v228_v11 }
 0x177   :  { %v724_v12 = vpop.eup %723 }
 0x178   :  { %v726_v14 = vpop.eup %725 }
 0x179   :  { %v728_v15 = vpop.eup %727  ;;  %v243_v16 = vadd.f32 %v726_v14, %v724_v12 }
 0x17a   :  { %v730_v18 = vpop.eup %729 }
 0x17b   :  { %v230_v19 = vadd.f32 %v730_v18, %v728_v15  ;;  %731 = vlog2.f32 %v243_v16 }
 0x17d   :  { %733 = vlog2.f32 %v230_v19  ;;  %v689_v19 = vld [vmem:[%s1072_s7 + $0x8] sm:$0xff] }
 0x181   :  { %v732_v20 = vpop.eup %731 }
 0x182   :  { %v245_v21 = vmul.f32 0.6931472, %v732_v20 }
 0x183   :  { %v734_v22 = vpop.eup %733 }
 0x184   :  { %v232_v23 = vmul.f32 0.6931472, %v734_v22  ;;  %v246_v25 = vadd.f32 %v245_v21, %v236_v2 }
 0x186   :  { %v233_v32 = vadd.f32 %v232_v23, %v223_v3  ;;  %288 = vmatpush.msrb.mxu1 %v246_v25 }
 0x187   :  { %681 = vmatmul.msk.f32.vlgmr.msrb.gmra.mxu1 %vm175_vm1, %v679_v31 }
 0x188   :  { %267 = vmatpush.msra.mxu3 %v233_v32  ;;  %387 = vmatpush.msra.mxu1 %v952_v30 }
 0x189   :  { %680 = vmatmul.msk.f32.vlgmr.msra.gmra.mxu3 %vm175_vm1, %v679_v31 }
 0x18f   :  { %684 = vmatmul.msk.f32.vlgmr.msra.gmra.mxu1 %vm175_vm1, %v368_v43 }
 0x204   :  { %v290_v33 = vpop.f32.mrf.mxu1 }
 0x205   :  { %v979_v34 = vadd.f32 %v290_v33, %v216_v60 }
 0x207   :  { %v295_v36 = vadd.f32 %v979_v34, %v943_v26 }
 0x209   :  { %v297_v39 = vadd.f32 %v295_v36, %v945_v27  ;;  %v310_v40 = vadd.f32 %v295_v36, %v941_v24 }
 0x20c   :  { %v269_v35 = vpop.f32.mrf.mxu3  ;;  %v389_v3 = vpop.f32.mrf.mxu1 }
 0x20d   :  { %v983_v37 = vadd.f32 %v269_v35, %v196_v58  ;;  %v693_v58 = vld [vmem:[%s1072_s7 + $0x10] sm:$0xff] }
 0x20f   :  { %v294_v38 = vadd.f32 %v983_v37, %v952_v30 }
 0x211   :  { %v296_v41 = vadd.f32 %v294_v38, %v947_v28  ;;  %v309_v42 = vadd.f32 %v294_v38, %v949_v29  ;;  %v127_v28 = vld [vmem:[%s1069_s4] sm:$0xff] }
 0x212   :  { %419 = vperm.xlu1 %705, %v127_v28   ;;  %440 = vperm.xlu0 %707, %v127_v28  }
 0x213   :  { %v298_v44 = vmax.f32 %v296_v41, %v297_v39  ;;  %v311_v45 = vmax.f32 %v309_v42, %v310_v40  ;;  %414 = vperm.xlu2 %704, %v127_v28  }
 0x215   :  { %v299_v46 = vsub.f32 %v296_v41, %v298_v44  ;;  %v302_v47 = vsub.f32 %v297_v39, %v298_v44  ;;  %v312_v48 = vsub.f32 %v309_v42, %v311_v45  ;;  %v315_v49 = vsub.f32 %v310_v40, %v311_v45 }
 0x217   :  { %v300_v50 = vmul.f32 1.442695, %v299_v46  ;;  %v303_v27 = vmul.f32 1.442695, %v302_v47  ;;  %v313_v51 = vmul.f32 1.442695, %v312_v48 }
 0x218   :  { %v316_v24 = vmul.f32 1.442695, %v315_v49  ;;  %v686_v48 = vld [vmem:[%s1071_s6 + $0x8] sm:$0xff] }
 0x219   :  { %735 = vpow2.f32 %v300_v50 }
 0x21a   :  { %737 = vpow2.f32 %v303_v27  ;;  %708 = vset.pattern.permute.xlu1 %v814_v13  ;;  %710 = vset.pattern.permute.xlu0 %v814_v13 }
 0x21b   :  { %739 = vpow2.f32 %v313_v51  ;;  %458 = vperm.xlu1 %708, %v455_v52   ;;  %706 = vset.pattern.permute.xlu2 %v816_v17  ;;  %v322_v17 = vld [vmem:[%s1070_s5] sm:$0xff] }
 0x21c   :  { %741 = vpow2.f32 %v316_v24  ;;  %435 = vperm.xlu2 %706, %v127_v28  }
 0x21f   :  { %v736_v29 = vpop.eup %735 }
 0x220   :  { %v738_v53 = vpop.eup %737 }
 0x221   :  { %v740_v54 = vpop.eup %739  ;;  %v305_v55 = vadd.f32 %v738_v53, %v736_v29 }
 0x222   :  { %v742_v56 = vpop.eup %741 }
 0x223   :  { %743 = vlog2.f32 %v305_v55  ;;  %v318_v57 = vadd.f32 %v742_v56, %v740_v54  ;;  %626 = vperm.xlu1 %708, %v693_v58  }
 0x224   :  { %709 = vset.pattern.permute.xlu2 %v814_v13 }
 0x225   :  { %745 = vlog2.f32 %v318_v57  ;;  %542 = vperm.xlu2 %709, %v689_v19  }
 0x229   :  { %v744_v59 = vpop.eup %743 }
 0x22a   :  { %v307_v60 = vmul.f32 0.6931472, %v744_v59 }
 0x22b   :  { %v746_v61 = vpop.eup %745 }
 0x22c   :  { %v308_v62 = vadd.f32 %v307_v60, %v298_v44  ;;  %v320_v63 = vmul.f32 0.6931472, %v746_v61 }
 0x22e   :  { %341 = vmatpush.msrb.mxu2 %v308_v62  ;;  %v321_v0 = vadd.f32 %v320_v63, %v311_v45 }
 0x22f   :  { %682 = vmatmul.msk.f32.vlgmr.msrb.gmra.mxu2 %vm175_vm1, %v322_v17 }
 0x230   :  { %362 = vmatpush.msrb.mxu3 %v321_v0  ;;  %407 = vmatpush.msra.mxu2 %v943_v26 }
 0x231   :  { %683 = vmatmul.msk.f32.vlgmr.msrb.gmra.mxu3 %vm175_vm1, %v322_v17 }
 0x237   :  { %685 = vmatmul.msk.f32.vlgmr.msra.gmra.mxu2 %vm175_vm1, %v368_v43 }
 0x26d   :  { %v1015_v1 = vpop.permute.xlu2 %414 }
 0x26e   :  { %v417_v8 = vadd.f32 %v1015_v1, %v389_v3 }
 0x276   :  { %v1019_v2 = vpop.permute.xlu2 %435 }
 0x277   :  { %v438_v6 = vadd.f32 %v1019_v2, %v389_v3 }
 0x284   :  { %v1021_v4 = vpop.permute.xlu1 %419  ;;  %v1023_v5 = vpop.permute.xlu0 %440 }
 0x28d   :  { %v459_v43 = vpop.permute.xlu1 %458 }
 0x2b2   :  { %v1017_v13 = vpop.f32.mrf.mxu2 }
 0x2b4   :  { %v1039_v50 = vpop.f32.mrf.mxu3 }
 0x2ba   :  { %v409_v7 = vpop.f32.mrf.mxu2 }
 0x2bb   :  { %v422_v9 = vadd.f32 %v1021_v4, %v409_v7  ;;  %v443_v10 = vadd.f32 %v1023_v5, %v409_v7 }
 0x2bd   :  { %v423_v11 = vmax.f32 %v417_v8, %v422_v9  ;;  %v444_v12 = vmax.f32 %v438_v6, %v443_v10 }
 0x2bf   :  { %v424_v14 = vsub.f32 %v417_v8, %v423_v11  ;;  %v427_v15 = vsub.f32 %v422_v9, %v423_v11  ;;  %v445_v16 = vsub.f32 %v438_v6, %v444_v12  ;;  %v448_v18 = vsub.f32 %v443_v10, %v444_v12 }
 0x2c1   :  { %v425_v20 = vmul.f32 1.442695, %v424_v14  ;;  %v428_v21 = vmul.f32 1.442695, %v427_v15  ;;  %v446_v22 = vmul.f32 1.442695, %v445_v16 }
 0x2c2   :  { %v449_v23 = vmul.f32 1.442695, %v448_v18 }
 0x2c3   :  { %747 = vpow2.f32 %v425_v20 }
 0x2c4   :  { %749 = vpow2.f32 %v428_v21 }
 0x2c5   :  { %751 = vpow2.f32 %v446_v22  ;;  %v690_v22 = vld [vmem:[%s1071_s6 + $0x10] sm:$0xff]  ;;  %s817_s6 = smov [#allocation2]  }
 0x2c6   :  { %753 = vpow2.f32 %v449_v23  ;;  %s648_s10 = sshll.u32 %s817_s6, 4  ;;  %s649_s10 = int_to_ptr.vmem [resolvable:$true] %s648_s10 }
 0x2c9   :  { %v748_v25 = vpop.eup %747 }
 0x2ca   :  { %v750_v31 = vpop.eup %749 }
 0x2cb   :  { %v752_v32 = vpop.eup %751  ;;  %v430_v33 = vadd.f32 %v750_v31, %v748_v25 }
 0x2cc   :  { %v754_v35 = vpop.eup %753 }
 0x2cd   :  { %755 = vlog2.f32 %v430_v33  ;;  %v451_v36 = vadd.f32 %v754_v35, %v752_v32 }
 0x2cf   :  { %757 = vlog2.f32 %v451_v36 }
 0x2d3   :  { %v756_v38 = vpop.eup %755 }
 0x2d4   :  { %v432_v39 = vmul.f32 0.6931472, %v756_v38 }
 0x2d5   :  { %v758_v40 = vpop.eup %757 }
 0x2d6   :  { %v433_v41 = vadd.f32 %v432_v39, %v423_v11  ;;  %v453_v42 = vmul.f32 0.6931472, %v758_v40  ;;  %v543_v11 = vpop.permute.xlu2 %542 }
 0x2d8   :  { %v454_v44 = vadd.f32 %v453_v42, %v444_v12  ;;  %v461_v45 = vmul.f32 %v459_v43, %v433_v41 }
 0x2da   :  { %v463_v46 = vmul.f32 %v459_v43, %v454_v44  ;;  %v465_v47 = vadd.f32 %v461_v45, %v952_v30 }
 0x2dc   :  { %v466_v49 = vadd.f32 %v463_v46, %v943_v26  ;;  %487 = vmatpush.msra.mxu3 %v465_v47 }
 0x2dd   :  { %687 = vmatmul.msk.f32.vlgmr.msra.gmra.mxu3 %vm175_vm1, %v686_v48 }
 0x2de   :  { %507 = vmatpush.msrb.mxu1 %v466_v49 }
 0x2df   :  { %688 = vmatmul.msk.f32.vlgmr.msrb.gmra.mxu1 %vm175_vm1, %v686_v48 }
 0x35c   :  { %v509_v27 = vpop.f32.mrf.mxu1 }
 0x35d   :  { %v513_v24 = vadd.f32 %v509_v27, %v1021_v4  ;;  %v526_v28 = vadd.f32 %v509_v27, %v1023_v5 }
 0x360   :  { %v489_v51 = vpop.f32.mrf.mxu3 }
 0x361   :  { %v512_v29 = vadd.f32 %v489_v51, %v1015_v1  ;;  %v525_v52 = vadd.f32 %v489_v51, %v1019_v2 }
 0x363   :  { %v514_v53 = vmax.f32 %v512_v29, %v513_v24  ;;  %v527_v54 = vmax.f32 %v525_v52, %v526_v28 }
 0x365   :  { %v515_v55 = vsub.f32 %v512_v29, %v514_v53  ;;  %v518_v56 = vsub.f32 %v513_v24, %v514_v53  ;;  %v528_v57 = vsub.f32 %v525_v52, %v527_v54  ;;  %v531_v58 = vsub.f32 %v526_v28, %v527_v54 }
 0x366   :  { %v346_v28 = vadd.f32 %v1017_v13, %v983_v37 }
 0x367   :  { %v516_v59 = vmul.f32 1.442695, %v515_v55  ;;  %v519_v60 = vmul.f32 1.442695, %v518_v56  ;;  %v529_v61 = vmul.f32 1.442695, %v528_v57 }
 0x368   :  { %v532_v62 = vmul.f32 1.442695, %v531_v58  ;;  %v633_v57 = vadd.f32 %v346_v28, %v952_v30 }
 0x369   :  { %759 = vpow2.f32 %v516_v59 }
 0x36a   :  { %761 = vpow2.f32 %v519_v60 }
 0x36b   :  { %763 = vpow2.f32 %v529_v61 }
 0x36c   :  { %765 = vpow2.f32 %v532_v62 }
 0x36f   :  { %v760_v63 = vpop.eup %759 }
 0x370   :  { %v762_v17 = vpop.eup %761 }
 0x371   :  { %v764_v0 = vpop.eup %763  ;;  %v521_v3 = vadd.f32 %v762_v17, %v760_v63 }
 0x372   :  { %v766_v6 = vpop.eup %765 }
 0x373   :  { %767 = vlog2.f32 %v521_v3  ;;  %v534_v7 = vadd.f32 %v766_v6, %v764_v0 }
 0x375   :  { %769 = vlog2.f32 %v534_v7 }
 0x379   :  { %v768_v8 = vpop.eup %767 }
 0x37a   :  { %v523_v9 = vmul.f32 0.6931472, %v768_v8 }
 0x37b   :  { %v770_v10 = vpop.eup %769 }
 0x37c   :  { %v524_v12 = vadd.f32 %v523_v9, %v514_v53  ;;  %v536_v14 = vmul.f32 0.6931472, %v770_v10  ;;  %v627_v53 = vpop.permute.xlu1 %626 }
 0x37e   :  { %v537_v15 = vadd.f32 %v536_v14, %v527_v54  ;;  %v545_v16 = vmul.f32 %v543_v11, %v524_v12  ;;  %v367_v54 = vadd.f32 %v1039_v50, %v979_v34 }
 0x380   :  { %v546_v18 = vadd.f32 %v545_v16, %v461_v45  ;;  %v547_v19 = vmul.f32 %v543_v11, %v537_v15  ;;  %v635_v60 = vadd.f32 %v367_v54, %v943_v26 }
 0x382   :  { %v548_v20 = vadd.f32 %v547_v19, %v463_v46  ;;  %v549_v21 = vadd.f32 %v546_v18, %v952_v30 }
 0x384   :  { %v550_v23 = vadd.f32 %v548_v20, %v943_v26  ;;  %571 = vmatpush.msrb.mxu2 %v549_v21 }
 0x385   :  { %691 = vmatmul.msk.f32.vlgmr.msrb.gmra.mxu2 %vm175_vm1, %v690_v22 }
 0x386   :  { %591 = vmatpush.msrb.mxu3 %v550_v23 }
 0x387   :  { %692 = vmatmul.msk.f32.vlgmr.msrb.gmra.mxu3 %vm175_vm1, %v690_v22 }
 0x408   :  { %v573_v25 = vpop.f32.mrf.mxu2 }
 0x409   :  { %v596_v31 = vadd.f32 %v573_v25, %v1015_v1  ;;  %v609_v32 = vadd.f32 %v573_v25, %v1019_v2 }
 0x40a   :  { %v593_v33 = vpop.f32.mrf.mxu3 }
 0x40b   :  { %v597_v35 = vadd.f32 %v593_v33, %v1021_v4  ;;  %v610_v36 = vadd.f32 %v593_v33, %v1023_v5 }
 0x40d   :  { %v598_v38 = vmax.f32 %v596_v31, %v597_v35  ;;  %v611_v39 = vmax.f32 %v609_v32, %v610_v36 }
 0x40f   :  { %v599_v40 = vsub.f32 %v596_v31, %v598_v38  ;;  %v602_v41 = vsub.f32 %v597_v35, %v598_v38  ;;  %v612_v42 = vsub.f32 %v609_v32, %v611_v39  ;;  %v615_v43 = vsub.f32 %v610_v36, %v611_v39 }
 0x411   :  { %v600_v44 = vmul.f32 1.442695, %v599_v40  ;;  %v603_v45 = vmul.f32 1.442695, %v602_v41  ;;  %v613_v46 = vmul.f32 1.442695, %v612_v42 }
 0x412   :  { %v616_v47 = vmul.f32 1.442695, %v615_v43 }
 0x413   :  { %771 = vpow2.f32 %v600_v44 }
 0x414   :  { %773 = vpow2.f32 %v603_v45 }
 0x415   :  { %775 = vpow2.f32 %v613_v46 }
 0x416   :  { %777 = vpow2.f32 %v616_v47 }
 0x419   :  { %v772_v1 = vpop.eup %771 }
 0x41a   :  { %v774_v2 = vpop.eup %773 }
 0x41b   :  { %v776_v48 = vpop.eup %775  ;;  %v605_v4 = vadd.f32 %v774_v2, %v772_v1 }
 0x41c   :  { %v778_v49 = vpop.eup %777 }
 0x41d   :  { %779 = vlog2.f32 %v605_v4  ;;  %v618_v5 = vadd.f32 %v778_v49, %v776_v48 }
 0x41f   :  { %781 = vlog2.f32 %v618_v5 }
 0x423   :  { %v780_v27 = vpop.eup %779 }
 0x424   :  { %v607_v51 = vmul.f32 0.6931472, %v780_v27 }
 0x425   :  { %v782_v24 = vpop.eup %781 }
 0x426   :  { %v608_v29 = vadd.f32 %v607_v51, %v598_v38  ;;  %v620_v52 = vmul.f32 0.6931472, %v782_v24 }
 0x428   :  { %v621_v55 = vadd.f32 %v620_v52, %v611_v39  ;;  %v629_v56 = vmul.f32 %v627_v53, %v608_v29 }
 0x42a   :  { %v630_v58 = vadd.f32 %v629_v56, %v546_v18  ;;  %v631_v59 = vmul.f32 %v627_v53, %v621_v55 }
 0x42c   :  { %v632_v61 = vadd.f32 %v631_v59, %v548_v20  ;;  %v634_v62 = vadd.f32 %v633_v57, %v630_v58 }
 0x42e   :  { %v636_v63 = vadd.f32 %v635_v60, %v632_v61 }
 0x430   :  { %v637_v17 = vsub.f32 %v634_v62, %v636_v63 }
 0x432   :  { %v638_v0 = vmul.f32 1.442695, %v637_v17 }
 0x434   :  { %783 = vpow2.f32 %v638_v0 }
 0x43a   :  { %v784_v37 = vpop.eup %783 }
 0x43b   :  { %v640_v13 = vadd.f32 1.0, %v784_v37 }
 0x43d   :  { %785 = vrcp.f32 %v640_v13 }
 0x443   :  { %v786_v30 = vpop.eup %785 }
 0x444   :  { %642 = vst [vmem:[#allocation2] sm:$0xff] %v786_v30 }
 0x445   :  { %653 = dma.vmem_to_hbm [thread:$0]  %s649_s10, 128, %s651_s13, [#allocation3]  }
 0x446   :  { %811 = dma.done.wait [#allocation3], 128  }
 0x447   :  { %812 = vsyncadd [#allocation3], 4294967168 }
 0x448   :  { %658 = vsyncpa [#allocation3], 1 }

</bundles_post_ra>
